<compile_context>
chip_gen: v5e
topology: v5e:2x2
jax: 0.10.0
libtpu: 0.0.40
codegen_flags: <defaults>
</compile_context>

<pallas_src>
import functools

import jax
import jax.numpy as jnp
from jax import lax
from jax.experimental import pallas as pl
from jax.experimental.pallas import tpu as pltpu

# ---- small test config (reference module: hidden=1024, heads=16, inter=2048,
# ---- 27 layers, vocab=50257; scaled down here for a fast synthetic run) ----
VOCAB = 1000
HIDDEN = 128
INTER = 256
NUM_HEADS = 4
HEAD_DIM = HIDDEN // NUM_HEADS          # 32, even (required for RoPE)
NUM_LAYERS = 3
EPS = 1e-8

ACT_DTYPE = jnp.bfloat16                # MXU-facing activations / weights


def _pick_vmem_limit():
    """Per-generation scoped-VMEM limit: ~96 MiB on 128 MiB parts (v5e/v6e),
    ~48 MiB on v7x (64 MiB/TC), never below 32 MiB."""
    try:
        info = pltpu.get_tpu_info()
        cap = int(getattr(info, "vmem_capacity_bytes", 64 * 1024 * 1024))
    except Exception:
        cap = 64 * 1024 * 1024
    return int(min(96 * 1024 * 1024, max(32 * 1024 * 1024, cap - 16 * 1024 * 1024)))


VMEM_LIMIT = _pick_vmem_limit()


def _tile(dim, prefs):
    """Largest preferred tile that evenly divides `dim`, else the full dim."""
    for t in prefs:
        if t <= dim and dim % t == 0:
            return t
    return dim


# --------------------------------------------------------------------------
# In-kernel interleaved RoPE on a (rows, gw) slab whose lanes are hpb heads
# of head_dim each.  Pair swap via XLU rolls + lane-parity select; sin table
# is pre-signed (-sin on even lanes, +sin on odd), cos is pair-duplicated.
# --------------------------------------------------------------------------
def _rope(x, cos, sin_signed):
    gw = x.shape[-1]
    lane = lax.broadcasted_iota(jnp.int32, x.shape, x.ndim - 1)
    even = (lane % 2) == 0
    nxt = pltpu.roll(x, shift=gw - 1, axis=x.ndim - 1)   # x[j+1]
    prv = pltpu.roll(x, shift=1, axis=x.ndim - 1)        # x[j-1]
    swapped = jnp.where(even, nxt, prv)
    return x * cos + swapped * sin_signed


# --------------------------------------------------------------------------
# Full-K tiled matmul (fused QKV projection).  One dot per grid step, no
# accumulator scratch, no k axis.
# --------------------------------------------------------------------------
def _matmul_kernel(a_ref, b_ref, o_ref):
    o_ref[...] = jnp.dot(a_ref[...], b_ref[...],
                         preferred_element_type=jnp.float32).astype(o_ref.dtype)


def matmul(a, b, out_dtype=ACT_DTYPE):
    M, K = a.shape
    K2, N = b.shape
    assert K == K2
    bm = _tile(M, (512, 256, 128))
    bn = _tile(N, (512, 256, 128))
    return pl.pallas_call(
        _matmul_kernel,
        out_shape=jax.ShapeDtypeStruct((M, N), out_dtype),
        grid=(M // bm, N // bn),
        in_specs=[pl.BlockSpec((bm, K), lambda i, j: (i, 0)),
                  pl.BlockSpec((K, bn), lambda i, j: (0, j))],
        out_specs=pl.BlockSpec((bm, bn), lambda i, j: (i, j)),
        compiler_params=pltpu.CompilerParams(
            dimension_semantics=("parallel", "parallel"),
            vmem_limit_bytes=VMEM_LIMIT),
    )(a, b)


# --------------------------------------------------------------------------
# Output projection fused with residual add + RMSNorm (full-N, full-K block so
# the row-wise norm reduction stays inside one tile).
# rms = sqrt(mean(z^2)); out = z / (rms + eps) * g   (exact divide)
# --------------------------------------------------------------------------
def _matmul_add_rms_kernel(a_ref, w_ref, r_ref, g_ref, o_ref, *, eps):
    y = jnp.dot(a_ref[...], w_ref[...], preferred_element_type=jnp.float32)
    z = r_ref[...].astype(jnp.float32) + y
    rms = jnp.sqrt(jnp.mean(z * z, axis=-1, keepdims=True))
    o_ref[...] = (z / (rms + eps) * g_ref[...]).astype(o_ref.dtype)


def matmul_add_rmsnorm(a2d, w, resid2d, g_row, eps=EPS, out_dtype=ACT_DTYPE):
    M, K = a2d.shape
    _, N = w.shape
    bm = _tile(M, (512, 256, 128))
    kernel = functools.partial(_matmul_add_rms_kernel, eps=eps)
    return pl.pallas_call(
        kernel,
        out_shape=jax.ShapeDtypeStruct((M, N), out_dtype),
        grid=(M // bm,),
        in_specs=[pl.BlockSpec((bm, K), lambda i: (i, 0)),
                  pl.BlockSpec((K, N), lambda i: (0, 0)),     # weight resident
                  pl.BlockSpec((bm, N), lambda i: (i, 0)),    # residual
                  pl.BlockSpec((1, N), lambda i: (0, 0))],
        out_specs=pl.BlockSpec((bm, N), lambda i: (i, 0)),
        compiler_params=pltpu.CompilerParams(
            dimension_semantics=("parallel",),
            vmem_limit_bytes=VMEM_LIMIT),
    )(a2d, w, resid2d, g_row)


# --------------------------------------------------------------------------
# FFN fused with residual add + RMSNorm, row-tiled:
#   x @ W1 -> exact GELU -> @ W2 -> + x -> RMSNorm
# (x serves as both FFN input and residual -> single HBM read.)
# --------------------------------------------------------------------------
def _ffn_add_rms_kernel(x_ref, w1_ref, w2_ref, g_ref, o_ref, *, eps):
    x = x_ref[...]
    h = jnp.dot(x, w1_ref[...], preferred_element_type=jnp.float32)
    h = jax.nn.gelu(h, approximate=False)           # exact erf-GELU (matches nn.GELU())
    y = jnp.dot(h.astype(x.dtype), w2_ref[...], preferred_element_type=jnp.float32)
    z = x.astype(jnp.float32) + y
    rms = jnp.sqrt(jnp.mean(z * z, axis=-1, keepdims=True))
    o_ref[...] = (z / (rms + eps) * g_ref[...]).astype(o_ref.dtype)


def ffn_add_rmsnorm(x2d, w1, w2, g_row, eps=EPS, out_dtype=ACT_DTYPE):
    R, H = x2d.shape
    I = w1.shape[1]
    br = _tile(R, (512, 256, 128))
    kernel = functools.partial(_ffn_add_rms_kernel, eps=eps)
    # TODO(synk): on v7x (64 MiB VMEM), single-buffer the constant-index w1/w2
    # blocks via pipeline_mode=pl.Buffered(1) to free headroom for larger br.
    return pl.pallas_call(
        kernel,
        out_shape=jax.ShapeDtypeStruct((R, H), out_dtype),
        grid=(R // br,),
        in_specs=[pl.BlockSpec((br, H), lambda i: (i, 0)),
                  pl.BlockSpec((H, I), lambda i: (0, 0)),     # weights resident
                  pl.BlockSpec((I, H), lambda i: (0, 0)),
                  pl.BlockSpec((1, H), lambda i: (0, 0))],
        out_specs=pl.BlockSpec((br, H), lambda i: (i, 0)),
        compiler_params=pltpu.CompilerParams(
            dimension_semantics=("parallel",),
            vmem_limit_bytes=VMEM_LIMIT),
    )(x2d, w1, w2, g_row)


# --------------------------------------------------------------------------
# Final RMSNorm (no residual), row-tiled, exact math, f32 output.
# --------------------------------------------------------------------------
def _rmsnorm_kernel(x_ref, g_ref, o_ref, *, eps):
    z = x_ref[...].astype(jnp.float32)
    rms = jnp.sqrt(jnp.mean(z * z, axis=-1, keepdims=True))
    o_ref[...] = (z / (rms + eps) * g_ref[...]).astype(o_ref.dtype)


def rmsnorm(x2d, g_row, eps=EPS, out_dtype=jnp.float32):
    R, H = x2d.shape
    br = _tile(R, (1024, 512, 256, 128))
    kernel = functools.partial(_rmsnorm_kernel, eps=eps)
    return pl.pallas_call(
        kernel,
        out_shape=jax.ShapeDtypeStruct((R, H), out_dtype),
        grid=(R // br,),
        in_specs=[pl.BlockSpec((br, H), lambda i: (i, 0)),
                  pl.BlockSpec((1, H), lambda i: (0, 0))],
        out_specs=pl.BlockSpec((br, H), lambda i: (i, 0)),
        compiler_params=pltpu.CompilerParams(
            dimension_semantics=("parallel",),
            vmem_limit_bytes=VMEM_LIMIT),
    )(x2d, g_row)


# --------------------------------------------------------------------------
# Flash attention: grid (B, head-group, q-tile, kv-tile), online softmax with
# VMEM scratch.  RoPE'd + pre-scaled q cached in scratch at kv==0; K RoPE'd
# per kv tile.  One lane-dense (tq, gw>=128) context store at the last kv tile.
# --------------------------------------------------------------------------
def _make_flash_kernel(scale, hpb, head_dim):
    gw = hpb * head_dim

    def kernel(q_ref, k_ref, v_ref, cq_ref, sq_ref, ck_ref, sk_ref,
               ctx_ref, qrot_sc, m_sc, l_sc, acc_sc):
        ki = pl.program_id(3)
        nk = pl.num_programs(3)

        @pl.when(ki == 0)
        def _():
            # TODO(synk): on v6e/v7x the RoPE math could run in bf16 (bf16 VPU);
            # kept in f32 for a single v5e-safe path.
            q = _rope(q_ref[0].astype(jnp.float32), cq_ref[...], sq_ref[...])
            qrot_sc[...] = (q * scale).astype(qrot_sc.dtype)   # scale folded once
            m_sc[...] = jnp.full(m_sc.shape, -jnp.inf, jnp.float32)
            l_sc[...] = jnp.zeros(l_sc.shape, jnp.float32)
            acc_sc[...] = jnp.zeros(acc_sc.shape, jnp.float32)

        k = _rope(k_ref[0].astype(jnp.float32), ck_ref[...], sk_ref[...])
        k = k.astype(ACT_DTYPE)
        v = v_ref[0]                                           # (tk, gw) bf16

        for h in range(hpb):                                   # static unroll
            sl = slice(h * head_dim, (h + 1) * head_dim)
            s = lax.dot_general(qrot_sc[:, sl], k[:, sl],
                                (((1,), (1,)), ((), ())),
                                preferred_element_type=jnp.float32)   # (tq, tk)
            m_prev = m_sc[h]                                   # (tq, 1)
            m_new = jnp.maximum(m_prev, jnp.max(s, axis=-1, keepdims=True))
            alpha = jnp.exp(m_prev - m_new)
            p = jnp.exp(s - m_new)
            l_sc[h] = alpha * l_sc[h] + jnp.sum(p, axis=-1, keepdims=True)
            acc_sc[h] = alpha * acc_sc[h] + jnp.dot(
                p.astype(ACT_DTYPE), v[:, sl], preferred_element_type=jnp.float32)
            m_sc[h] = m_new

        @pl.when(ki == nk - 1)
        def _():
            parts = []
            for h in range(hpb):
                inv = pl.reciprocal(l_sc[h], approx=True)      # EUP; bf16 output
                parts.append(acc_sc[h] * inv)
            ctx_ref[0] = jnp.concatenate(parts, axis=-1).astype(ctx_ref.dtype)

    return kernel


def flash_attention(qkv, cos_tile, sin_tile, scale):
    """qkv: (B, S, 3H) bf16 (fused projection output). Returns ctx (B, S, H)."""
    B, S, H3 = qkv.shape
    H = H3 // 3
    D = HEAD_DIM
    hpb = min(H // D, max(1, 128 // D))          # heads per group -> >=128 lanes
    gw = hpb * D
    ng = H // gw
    tq = _tile(S, (512, 256, 128))
    tk = _tile(S, (512, 256, 128))

    kernel = _make_flash_kernel(scale, hpb, D)

    q_spec = pl.BlockSpec((1, tq, gw), lambda b, g, qi, ki: (b, qi, g))
    k_spec = pl.BlockSpec((1, tk, gw), lambda b, g, qi, ki: (b, ki, g + ng))
    v_spec = pl.BlockSpec((1, tk, gw), lambda b, g, qi, ki: (b, ki, g + 2 * ng))
    cq_spec = pl.BlockSpec((tq, gw), lambda b, g, qi, ki: (qi, 0))
    sq_spec = pl.BlockSpec((tq, gw), lambda b, g, qi, ki: (qi, 0))
    ck_spec = pl.BlockSpec((tk, gw), lambda b, g, qi, ki: (ki, 0))
    sk_spec = pl.BlockSpec((tk, gw), lambda b, g, qi, ki: (ki, 0))

    return pl.pallas_call(
        kernel,
        out_shape=jax.ShapeDtypeStruct((B, S, H), ACT_DTYPE),
        grid=(B, ng, S // tq, S // tk),
        in_specs=[q_spec, k_spec, v_spec, cq_spec, sq_spec, ck_spec, sk_spec],
        out_specs=pl.BlockSpec((1, tq, gw), lambda b, g, qi, ki: (b, qi, g)),
        scratch_shapes=[pltpu.VMEM((tq, gw), ACT_DTYPE),        # RoPE'd, scaled q
                        pltpu.VMEM((hpb, tq, 1), jnp.float32),  # running max
                        pltpu.VMEM((hpb, tq, 1), jnp.float32),  # running denom
                        pltpu.VMEM((hpb, tq, D), jnp.float32)], # context acc
        compiler_params=pltpu.CompilerParams(
            dimension_semantics=("parallel", "parallel", "parallel", "arbitrary"),
            vmem_limit_bytes=VMEM_LIMIT),
    )(qkv, qkv, qkv, cos_tile, sin_tile, cos_tile, sin_tile)


# --------------------------------------------------------------------------
# Optional attention-weights kernel (only when output_attentions=True).
# Kept off the main path so the flash kernel never pays for the (B,NH,S,S)
# store.  Full-S keys per q tile; softmax in f32, weights stored bf16.
# --------------------------------------------------------------------------
def _make_weights_kernel(scale, hpb, head_dim):
    def kernel(q_ref, k_ref, cq_ref, sq_ref, ck_ref, sk_ref, w_ref):
        q = _rope(q_ref[0].astype(jnp.float32), cq_ref[...], sq_ref[...]) * scale
        k = _rope(k_ref[0].astype(jnp.float32), ck_ref[...], sk_ref[...])
        q = q.astype(ACT_DTYPE)
        k = k.astype(ACT_DTYPE)
        for h in range(hpb):
            sl = slice(h * head_dim, (h + 1) * head_dim)
            s = lax.dot_general(q[:, sl], k[:, sl], (((1,), (1,)), ((), ())),
                                preferred_element_type=jnp.float32)
            m = jnp.max(s, axis=-1, keepdims=True)
            p = jnp.exp(s - m)
            w = p * pl.reciprocal(jnp.sum(p, axis=-1, keepdims=True), approx=True)
            w_ref[0, h] = w.astype(w_ref.dtype)
    return kernel


def attention_weights(qkv, cos_tile, sin_tile, scale):
    B, S, H3 = qkv.shape
    H = H3 // 3
    D = HEAD_DIM
    NH = H // D
    hpb = min(NH, max(1, 128 // D))
    gw = hpb * D
    ng = H // gw
    tq = _tile(S, (256, 128))

    kernel = _make_weights_kernel(scale, hpb, D)

    q_spec = pl.BlockSpec((1, tq, gw), lambda b, g, qi: (b, qi, g))
    k_spec = pl.BlockSpec((1, S, gw), lambda b, g, qi: (b, 0, g + ng))
    cq_spec = pl.BlockSpec((tq, gw), lambda b, g, qi: (qi, 0))
    sq_spec = pl.BlockSpec((tq, gw), lambda b, g, qi: (qi, 0))
    ck_spec = pl.BlockSpec((S, gw), lambda b, g, qi: (0, 0))
    sk_spec = pl.BlockSpec((S, gw), lambda b, g, qi: (0, 0))

    return pl.pallas_call(
        kernel,
        out_shape=jax.ShapeDtypeStruct((B, NH, S, S), ACT_DTYPE),
        grid=(B, ng, S // tq),
        in_specs=[q_spec, k_spec, cq_spec, sq_spec, ck_spec, sk_spec],
        out_specs=pl.BlockSpec((1, hpb, tq, S), lambda b, g, qi: (b, g, qi, 0)),
        compiler_params=pltpu.CompilerParams(
            dimension_semantics=("parallel", "parallel", "parallel"),
            vmem_limit_bytes=VMEM_LIMIT),
    )(qkv, qkv, cos_tile, sin_tile, cos_tile, sin_tile)


# --------------------------------------------------------------------------
# Rotary tables (host-side glue)
# --------------------------------------------------------------------------
def rotary_tables(seq_len, dim, heads_per_block):
    inv_freq = 1.0 / (10000.0 ** (jnp.arange(0, dim, 2, dtype=jnp.float32) / dim))
    pos = jnp.arange(seq_len, dtype=jnp.float32)
    freqs = pos[:, None] * inv_freq[None, :]                 # (S, dim//2)
    cos = jnp.cos(freqs)
    sin = jnp.sin(freqs)
    cos_full = jnp.repeat(cos, 2, axis=-1)                   # [c0,c0,c1,c1,...]
    sin_signed = jnp.stack([-sin, sin], axis=-1).reshape(seq_len, dim)  # [-s0,+s0,...]
    cos_tile = jnp.tile(cos_full, (1, heads_per_block))      # (S, hpb*dim)
    sin_tile = jnp.tile(sin_signed, (1, heads_per_block))
    return cos, sin, cos_tile, sin_tile


def apply_block_rotary(x, cos, sin, dim):
    # TRBlock.rotary: rotate only x[..., :dim] (interleaved pairs), rest unchanged.
    B, S, H = x.shape
    x1 = x[..., :dim].reshape(B, S, dim // 2, 2)
    x_even, x_odd = x1[..., 0], x1[..., 1]
    c, s = cos[None], sin[None]                              # (1, S, dim//2)
    r0 = x_even * c - x_odd * s
    r1 = x_even * s + x_odd * c
    rot = jnp.stack([r0, r1], axis=-1).reshape(B, S, dim)
    return jnp.concatenate([rot, x[..., dim:]], axis=-1)


# --------------------------------------------------------------------------
# Parameters (deterministic synthetic init; RMSNorm scales = ones)
# --------------------------------------------------------------------------
def init_params(key):
    keys = jax.random.split(key, 1 + NUM_LAYERS)
    emb = 0.02 * jax.random.normal(keys[0], (VOCAB, HIDDEN), jnp.float32)
    layers = []
    for l in range(NUM_LAYERS):
        k = jax.random.split(keys[1 + l], 6)
        wq = 0.02 * jax.random.normal(k[0], (HIDDEN, HIDDEN), jnp.float32)
        wk = 0.02 * jax.random.normal(k[1], (HIDDEN, HIDDEN), jnp.float32)
        wv = 0.02 * jax.random.normal(k[2], (HIDDEN, HIDDEN), jnp.float32)
        layers.append(dict(
            wqkv=jnp.concatenate([wq, wk, wv], axis=1).astype(ACT_DTYPE),  # fused
            wo=(0.02 * jax.random.normal(k[3], (HIDDEN, HIDDEN))).astype(ACT_DTYPE),
            w1=(0.02 * jax.random.normal(k[4], (HIDDEN, INTER))).astype(ACT_DTYPE),
            w2=(0.02 * jax.random.normal(k[5], (INTER, HIDDEN))).astype(ACT_DTYPE),
            g1=jnp.ones((1, HIDDEN), jnp.float32),
            g2=jnp.ones((1, HIDDEN), jnp.float32),
        ))
    return dict(emb=emb, layers=layers, g_final=jnp.ones((1, HIDDEN), jnp.float32))


# --------------------------------------------------------------------------
# Decoder layer + TRBlock forward
# --------------------------------------------------------------------------
def decoder_layer(x, p, cos_tile, sin_tile, emit_weights):
    B, S, H = x.shape
    x2d = x.reshape(B * S, H)
    qkv = matmul(x2d, p['wqkv']).reshape(B, S, 3 * H)   # fused Q/K/V projection

    scale = HEAD_DIM ** (-0.5)
    ctx = flash_attention(qkv, cos_tile, sin_tile, scale)
    attn_w = attention_weights(qkv, cos_tile, sin_tile, scale) if emit_weights else None

    # out-proj + residual + RMSNorm1 fused; FFN + residual + RMSNorm2 fused
    x2d = matmul_add_rmsnorm(ctx.reshape(B * S, H), p['wo'], x2d, p['g1'])
    x2d = ffn_add_rmsnorm(x2d, p['w1'], p['w2'], p['g2'])
    return x2d.reshape(B, S, H), attn_w


def trblock_forward(params, input_ids, output_hidden_states=True,
                    output_attentions=True):
    # attn_mask is None (module default) -> no masking branch, matching forward.
    B, S = input_ids.shape
    hpb = min(NUM_HEADS, max(1, 128 // HEAD_DIM))
    cos, sin, cos_tile, sin_tile = rotary_tables(S, HEAD_DIM, hpb)

    x = jnp.take(params['emb'], input_ids, axis=0)       # embedding gather (glue)
    x = apply_block_rotary(x, cos, sin, HEAD_DIM)        # TRBlock.rotary (glue)
    x = x.astype(ACT_DTYPE)

    hidden_states = [x] if output_hidden_states else None
    attentions = [] if output_attentions else None
    for p in params['layers']:
        x, w = decoder_layer(x, p, cos_tile, sin_tile, output_attentions)
        if output_hidden_states:
            hidden_states.append(x)
        if output_attentions:
            attentions.append(w)

    x2d = rmsnorm(x.reshape(B * S, HIDDEN), params['g_final'])   # final RMSNorm
    x = x2d.reshape(B, S, HIDDEN)
    return {'last_hidden_state': x,
            'past_key_values': None,
            'hidden_states': hidden_states,
            'attentions': attentions}


if __name__ == "__main__":
    key = jax.random.PRNGKey(0)
    pkey, ikey = jax.random.split(key)
    params = init_params(pkey)

    B, S = 2, 8
    input_ids = jax.random.randint(ikey, (B, S), 0, VOCAB)

    out = trblock_forward(params, input_ids)
    jax.block_until_ready(out['last_hidden_state'])
    for w in out['attentions']:
        jax.block_until_ready(w)
    for h in out['hidden_states']:
        jax.block_until_ready(h)
    print("KERNEL_OK")
</pallas_src>

<mosaic_0001>
module attributes {stable_mosaic.version = 11 : i64} {
  func.func @_matmul_kernel(%arg0: i32, %arg1: i32, %arg2: memref<16x128xbf16, #tpu.memory_space<vmem>>, %arg3: memref<128x128xbf16, #tpu.memory_space<vmem>>, %arg4: memref<16x128xbf16, #tpu.memory_space<vmem>>) attributes {dimension_semantics = [#tpu.dimension_semantics<parallel>, #tpu.dimension_semantics<parallel>], iteration_bounds = array<i64: 1, 3>, scalar_prefetch = 0 : i64, scratch_operands = 0 : i64, tpu.core_type = #tpu.core_type<tc>, window_params = [{transform_indices = @transform_0, window_bounds = array<i64: 16, 128>}, {transform_indices = @transform_1, window_bounds = array<i64: 128, 128>}, {transform_indices = @transform_2, window_bounds = array<i64: 16, 128>}]} {
    %c0 = arith.constant 0 : index
    %c0_0 = arith.constant 0 : index
    %0 = vector.load %arg2[%c0, %c0_0] : memref<16x128xbf16, #tpu.memory_space<vmem>>, vector<16x128xbf16>
    %c0_1 = arith.constant 0 : index
    %c0_2 = arith.constant 0 : index
    %1 = vector.load %arg3[%c0_1, %c0_2] : memref<128x128xbf16, #tpu.memory_space<vmem>>, vector<128x128xbf16>
    %cst = arith.constant dense<0.000000e+00> : vector<16x128xf32>
    %2 = tpu.matmul %0, %1, %cst {dimension_numbers = #tpu.dot_dimension_numbers<[1], [0], [0], [1], [0, 0, 1, 1], [], []>} : vector<16x128xbf16>, vector<128x128xbf16>, vector<16x128xf32> -> vector<16x128xf32>
    %3 = arith.truncf %2 : vector<16x128xf32> to vector<16x128xbf16>
    %c0_3 = arith.constant 0 : index
    %c0_4 = arith.constant 0 : index
    %4 = vector.load %arg4[%c0_3, %c0_4] : memref<16x128xbf16, #tpu.memory_space<vmem>>, vector<16x128xbf16>
    tpu.vector_store %arg4[%c0_3, %c0_4], %3 {strides = array<i32>} : memref<16x128xbf16, #tpu.memory_space<vmem>>, vector<16x128xbf16>,
    return
  }
  func.func @transform_0(%arg0: i32, %arg1: i32) -> (i32, i32) {
    %c0_i32 = arith.constant 0 : i32
    %c0_i32_0 = arith.constant 0 : i32
    return %arg0, %c0_i32 : i32, i32
  }
  func.func @transform_1(%arg0: i32, %arg1: i32) -> (i32, i32) {
    %c0_i32 = arith.constant 0 : i32
    %c0_i32_0 = arith.constant 0 : i32
    return %c0_i32, %arg1 : i32, i32
  }
  func.func @transform_2(%arg0: i32, %arg1: i32) -> (i32, i32) {
    %c0_i32 = arith.constant 0 : i32
    return %arg0, %arg1 : i32, i32
  }
}

</mosaic_0001>

<bundles_post_ra>
// kernel: tpu_custom_call.1
= control target key start
LH: loop header
LB: loop body
LE: loop exit
PB: predicated region body
PF: predicated region fallthrough
CT: control target
= control target key end

     0   :  { %7 = vsyncpa [#allocation3], 0  ;;  %s876_s0 = inlined_call_operand.hbm [shape: bf16[16,128], index: 0, kind: input, shape index: {}]   ;;  %s877_s1 = inlined_call_operand.hbm [shape: bf16[128,384], index: 1, kind: input, shape index: {}]   ;;  %s878_s2 = inlined_call_operand.hbm [shape: bf16[16,384], index: 2, kind: output, shape index: {}]  }
   0x1   :  { %8 = vsyncpa [#allocation6], 0 }
   0x2   :  { %10 = vsyncpa [#allocation6 + $0x1], 0 }
   0x3   :  { %11 = vsyncpa [#allocation4], 0 }
   0x4   :  { %13 = vsyncpa [#allocation4 + $0x1], 0  ;;  %s723_s9 = smov 0   ;;  %s725_s10 = smov 0  }
   0x5   :  { %s727_s11 = smov 0   ;;  %s729_s12 = smov 0  }
   0x6   :  { %s731_s13 = smov 0   ;;  %s733_s14 = smov 0  }
   0x7 LB: > { %s409_s15 = sadd.s32 4294967295, %s699_s14   ;;  %s410_s16 = sadd.s32 4294967294, %s699_s14   ;;  %s699_s14 = sphi %s733_s14, %s19_s14   ;;  %s695_s13 = sphi %s731_s13, %s892_s13   ;;  %s691_s12 = sphi %s729_s12, %s891_s12   ;;  %s687_s11 = sphi %s727_s11, %s890_s11   ;;  %s683_s10 = sphi %s725_s10, %s889_s10   ;;  %s679_s9 = sphi %s723_s9, %s888_s9  }
   0x8   : > { %p77_p0 = scmp.ne.s32.totalorder %s683_s10, %s679_s9  ;;  %p757_p1 = scmp.eq.s32.totalorder %s409_s15, 0 }
   0x9   : > { %p761_p2 = scmp.eq.s32.totalorder %s409_s15, 2  ;;  %p109_p3 = scmp.eq.s32.totalorder %s410_s16, 2 }
   0xa   : > { %p767_p4 = por %p757_p1, %p77_p0  ;;  %p411_p5 = scmp.ge.s32.totalorder %s699_s14, 1 }
   0xb   : > { %p772_p6 = por %p109_p3, %p77_p0  ;;  %p116_p7 = scmp.lt.s32.totalorder %s699_s14, 4 }
   0xc   : > { %s130_s23 = sshll.u32 %s876_s0, 4  ;;  %s701_s25 = smov [#allocation2]   ;;  %s131_s23 = int_to_ptr.hbm [resolvable:$true] %s130_s23 }
   0xd   : > { %p780_p8 = pnand %p411_p5, %p116_p7  ;;  %s132_s26 = sshll.u32 %s701_s25, 4  ;;  %s133_s26 = int_to_ptr.vmem [resolvable:$true] %s132_s26 }
   0xe   : > { %s879_s27 = smov 64   ;;  %s703_s28 = smov 4  }
   0xf   : > { %p482_p9 = pneg %p780_p8  ;;  %s28_s29 = sadd.s32 1, %s695_s13 }
  0x10   : > { %p29_p11 = scmp.ge.s32.totalorder %s28_s29, 3  ;;  %s64_s30 = sadd.s32 1, %s687_s11 }
  0x11   : > { %p483_p10 = pnand %p482_p9, %p757_p1  ;;  %p71_p12 = scmp.ne.s32.totalorder %s687_s11, %s683_s10 }
  0x12   : > { %p72_p13 = scmp.eq.s32.totalorder %s699_s14, 0  ;;  %s894_s29 = smov (%p29_p11, %s28_s29), 0 }
  0x13   : > { %485 = dma.hbm_to_vmem [thread:$0]  (!%p483_p10), %s131_s23, 128, %s133_s26, [#allocation3], %s879_s27, %s879_s27, %s703_s28  }
  0x14   : > { %p798_p0 = por %p72_p13, %p71_p12  ;;  %p804_p3 = por %p761_p2, %p71_p12 }
  0x15   : > { %s61_s5 = ssub.s32 %s695_s13, %s894_s29  ;;  %p495_p5 = scmp.lt.s32.totalorder %s699_s14, 3 }
  0x16   : > { %p62_p7 = scmp.eq.s32.totalorder %s61_s5, 0  ;;  %s146_s6 = sand.u32 1, %s687_s11  }
  0x17   : > { %s414_s7 = sshll.u32 %s146_s6, 6  ;;  %s415_s15 = sshll.u32 %s695_s13, 2 }
  0x18   : > { %s813_s8 = scalar_select %p62_p7, %s687_s11, %s64_s30  }
  0x19   : > { %s154_s22 = scalar_lea.hbm %s877_s1, %s415_s15  ;;  %s150_s23 = scalar_lea.vmem [#allocation5], %s414_s7 }
  0x1a   : > { %s157_s25 = sshll.u32 %s150_s23, 4  ;;  %s155_s18 = sshll.u32 %s154_s22, 4  ;;  %s158_s25 = int_to_ptr.vmem [resolvable:$true] %s157_s25  ;;  %s156_s18 = int_to_ptr.hbm [resolvable:$true] %s155_s18 }
  0x1b   : > { %p487_p2 = pnand %p495_p5, %p798_p0  ;;  %s147_s26 = scalar_lea.sflag [#allocation6], %s146_s6 }
  0x1c   : > { %s704_s27 = smov 192   ;;  %s887_s5 = smov 64  }
  0x1d   : > { %489 = dma.hbm_to_vmem [thread:$0]  (!%p487_p2), %s156_s18, 1024, %s158_s25, %s147_s26, %s704_s27, %s887_s5, %s703_s28  }
  0x1e   : > { %169 = sbr.rel (%p780_p8) target bundleno = 213 (0xd5), region = 28 }
  0x23   : > { %666 = dma.done.wait (%p757_p1), [#allocation3], 128  }
  0x24   : > { %668 = vsyncadd (%p757_p1), [#allocation3], 4294967168  ;;  %s830_s30 = sand.u32 1, %s683_s10  }
  0x25   : > { %s418_s3 = sshll.u32 %s830_s30, 6  ;;  %s177_s6 = scalar_lea.sflag [#allocation6], %s830_s30 }
  0x26   : > { %s180_s7 = scalar_lea.vmem [#allocation5], %s418_s3 }
  0x27   : > { %670 = dma.done.wait (%p767_p4), %s177_s6, 1024  }
  0x28   : > { %672 = vsyncadd (%p767_p4), %s177_s6, 4294966272  ;;  %v468_v0 = vld [vmem:[%s180_s7 + $0x38] sm:$0xff]  ;;  %v467_v1 = vld [vmem:[%s180_s7 + $0x30] sm:$0xff]  ;;  %s419_s17 = sshll.u32 %s830_s30, 3  ;;  %s457_s19 = sshll.u32 %s691_s12, 2 }
  0x29   : > { %276 = vmatpush.bf16.msra.mxu0 %v468_v0  ;;  %v466_v2 = vld [vmem:[%s180_s7 + $0x28] sm:$0xff]  ;;  %v465_v3 = vld [vmem:[%s180_s7 + $0x20] sm:$0xff]  ;;  %v464_v4 = vld [vmem:[%s180_s7 + $0x18] sm:$0xff]  ;;  %s308_s28 = scalar_lea.hbm %s878_s2, %s457_s19  ;;  %s201_s15 = scalar_lea.vmem [#allocation7], %s419_s17 }
  0x2a   : > { %v463_v5 = vld [vmem:[%s180_s7 + $0x10] sm:$0xff]  ;;  %v462_v6 = vld [vmem:[%s180_s7 + $0x8] sm:$0xff]  ;;  %v461_v7 = vld [vmem:[%s180_s7] sm:$0xff]  ;;  %s309_s16 = sshll.u32 %s201_s15, 4  ;;  %s311_s21 = sshll.u32 %s308_s28, 4  ;;  %s310_s16 = int_to_ptr.vmem [resolvable:$true] %s309_s16  ;;  %s312_s21 = int_to_ptr.hbm [resolvable:$true] %s311_s21 }
  0x2b   : > { %v460_v8 = vld [vmem:[#allocation2] sm:$0xff]  ;;  %s295_s22 = scalar_lea.sflag [#allocation4], %s830_s30  ;;  %s627_s23 = sshra.s32 %s312_s21, 4  ;;  %s628_s23 = int_to_ptr.hbm [resolvable:$true] %s627_s23 }
  0x2c   : > { %s629_s25 = scalar_lea.hbm %s628_s23, 8  ;;  %s633_s26 = scalar_lea.hbm %s878_s2, 24 }
  0x2d   : > { %277 = vmatpush.bf16.msra.mxu0 %v467_v1  ;;  %p630_p1 = scmp.ne.s32.totalorder %s628_s23, %s629_s25  ;;  %p634_p9 = scmp.lt.s32.totalorder %s628_s23, %s878_s2 }
  0x2e   : > { %p635_p10 = scmp.lt.s32.totalorder %s633_s26, %s629_s25 }
  0x2f   : > { %p631_p4 = pnand %p630_p1, %p804_p3 }
  0x30   : > { %p636_p11 = por %p635_p10, %p634_p9 }
  0x31   : > { %278 = vmatpush.bf16.msra.mxu0 %v466_v2  ;;  %p632_p8 = pneg %p631_p4 }
  0x33   : > { %p637_p12 = pnand %p636_p11, %p632_p8 }
  0x35   : > { %279 = vmatpush.bf16.msra.mxu0 %v465_v3 }
  0x39   : > { %280 = vmatpush.bf16.msra.mxu0 %v464_v4 }
  0x3d   : > { %281 = vmatpush.bf16.msra.mxu0 %v463_v5 }
  0x41   : > { %282 = vmatpush.bf16.msra.mxu0 %v462_v6 }
  0x45   : > { %283 = vmatpush.bf16.msra.mxu0 %v461_v7 }
  0x48   : > { %284 = vmatmul.bf16.vlgmr.msra.gmra.mxu0 %v460_v8 }
  0xc5   : > { %v285_v9 = vpop.f32.mrf.mxu0 }
  0xcd   : > { %v287_v10 = vpop.f32.mrf.mxu0 }
  0xce   : > { %v472_v11 = vpack.c.bf16 %v287_v10, %v285_v9 }
  0xd0   : > { %473 = vst [vmem:[%s201_s15] sm:$0xff] %v472_v11  }
  0xd1   : > { %640 = shalt.err (!%p637_p12)
}
  0xd2   : > { %s705_s30 = smov 64   ;;  %s706_s6 = smov 192  }
  0xd3   : > { %s707_s7 = smov 4  }
  0xd4   : > { %480 = dma.vmem_to_hbm [thread:$0]  (%p804_p3), %s310_s16, 128, %s312_s21, %s295_s22, %s705_s30, %s706_s6, %s707_s7  }
  0xd5 PF: > { %p497_p13 = scmp.ge.s32.totalorder %s699_s14, 2  ;;  %s326_s17 = sand.u32 1, %s679_s9  }
  0xd6   : > { %s327_s19 = scalar_lea.sflag [#allocation4], %s326_s17 }
  0xd7   : > { %p491_p0 = pnand %p497_p13, %p772_p6 }
  0xd9   : > { %p492_p5 = pneg %p491_p0 }
  0xdb   : > { %674 = dma.done.wait (%p492_p5), %s327_s19, 128  }
  0xdc   : > { %676 = vsyncadd (%p492_p5), %s327_s19, 4294967168  ;;  %s19_s14 = sadd.s32 1, %s699_s14   ;;  %s888_s9 = smov %s683_s10 }
  0xdd   : > { %p16_p7 = scmp.ge.s32.totalorder %s19_s14, 5   ;;  %s889_s10 = smov %s687_s11 }
  0xde   : > { %s890_s11 = smov %s813_s8  ;;  %s891_s12 = smov %s695_s13 }
  0xdf   : > { %s892_s13 = smov %s894_s29  ;;  %18 = sbr.rel (!%p16_p7) target bundleno = 7 (0x7), region = 79 }
  0xe4   :  { %333 = vsyncpa [#allocation3], 1 }
  0xe5   :  { %335 = vsyncpa [#allocation3 + $0x1], 1 }
  0xe6   :  { %336 = vsyncpa [#allocation6], 1 }
  0xe7   :  { %338 = vsyncpa [#allocation6 + $0x1], 1 }
  0xe8   :  { %339 = vsyncpa [#allocation4], 1 }
  0xe9   :  { %341 = vsyncpa [#allocation4 + $0x1], 1 }

</bundles_post_ra>
